<compile_context>
chip_gen: v6e
topology: v6e:2x2x1
jax: 0.10.0
libtpu: 0.0.40
codegen_flags: <defaults>
</compile_context>

<pallas_src>
import numpy as np
import jax
import jax.numpy as jnp
from jax import lax
from jax.experimental import pallas as pl
from jax.experimental.pallas import tpu as pltpu

_BOX_OFFSETS = tuple((i, j, k) for i in (0, 1) for j in (0, 1) for k in (0, 1))
_P1, _P2, _P3 = 73856093, 19349663, 83492791


def _round_up(x, m):
    return ((x + m - 1) // m) * m


def _make_fused_kernel(block_b, n_levels, feat):
    lf = n_levels * feat

    def kernel(h_hbm_ref, w_ref, *rest):
        # h_hbm_ref : HBM (nblocks, block_b*L*8) int32 precomputed corner hashes
        # w_ref     : VMEM (3, block_b, L*F) f32 trilinear weights (per-level, repeated over F)
        # table_refs: L x VMEM (T_l, F) f32 hash tables (resident, constant block index)
        # o_ref     : VMEM (block_b, L*F) f32 interpolated features
        # h_smem    : SMEM (block_b*L*8,) int32 this block's hashes (for scalar addressing)
        # dma_sem   : DMA semaphore
        # gath      : VMEM (8*block_b, L*F) f32 gathered corner embeddings
        table_refs = rest[:n_levels]
        o_ref, h_smem, dma_sem, gath = rest[n_levels:]

        blk = pl.program_id(0)

        # Stream this block's hash slice HBM -> SMEM (scalars must live in SMEM to be
        # usable as dynamic-slice starts).
        cp = pltpu.make_async_copy(h_hbm_ref.at[blk], h_smem, dma_sem)
        cp.start()
        cp.wait()

        # Data-dependent row gather: 8 corners x L levels per point into VMEM scratch.
        def gather_point(p, carry):
            base = p * (n_levels * 8)
            for l in range(n_levels):
                tab = table_refs[l]
                col = l * feat
                for c in range(8):
                    h = h_smem[base + l * 8 + c]
                    row = tab[pl.ds(h, 1), :]                               # (1, F)
                    gath[pl.ds(c * block_b + p, 1), col:col + feat] = row
            return carry

        lax.fori_loop(0, block_b, gather_point, 0)

        # Fully vectorized trilinear interpolation over (block_b, L*F) tiles.
        wx = w_ref[0]
        wy = w_ref[1]
        wz = w_ref[2]
        e = [gath[pl.ds(c * block_b, block_b), :] for c in range(8)]
        c00 = e[0] * (1.0 - wx) + e[4] * wx
        c01 = e[1] * (1.0 - wx) + e[5] * wx
        c10 = e[2] * (1.0 - wx) + e[6] * wx
        c11 = e[3] * (1.0 - wx) + e[7] * wx
        c0 = c00 * (1.0 - wy) + c10 * wy
        c1 = c01 * (1.0 - wy) + c11 * wy
        o_ref[...] = c0 * (1.0 - wz) + c1 * wz

    return kernel


def _fused_hash_grid(h_blocks, w_exp, tables, *, block_b, n_levels, feat):
    nblocks = h_blocks.shape[0]
    b_pad = nblocks * block_b
    lf = n_levels * feat
    kernel = _make_fused_kernel(block_b, n_levels, feat)

    in_specs = [
        pl.BlockSpec(memory_space=pl.ANY),                           # hashes stay in HBM
        pl.BlockSpec((3, block_b, lf), lambda i: (0, i, 0)),         # weights
    ] + [
        pl.BlockSpec(t.shape, lambda i: (0, 0)) for t in tables      # full tables, VMEM-resident
    ]

    return pl.pallas_call(
        kernel,
        out_shape=jax.ShapeDtypeStruct((b_pad, lf), jnp.float32),
        grid_spec=pltpu.PrefetchScalarGridSpec(
            num_scalar_prefetch=0,
            grid=(nblocks,),
            in_specs=in_specs,
            out_specs=pl.BlockSpec((block_b, lf), lambda i: (i, 0)),
            scratch_shapes=[
                pltpu.SMEM((block_b * n_levels * 8,), jnp.int32),
                pltpu.SemaphoreType.DMA(()),
                pltpu.VMEM((8 * block_b, lf), jnp.float32),
            ],
        ),
        compiler_params=pltpu.CompilerParams(
            dimension_semantics=("parallel",),
        ),
    )(h_blocks, w_exp, *tables)


class GridEmbedder:
    """JAX/Pallas port of the PyTorch GridEmbedder (multi-level hash grid)."""

    def __init__(self, bounding_box, tables, resolutions, log2_hashmap_size, block_b=256):
        self.box_min, self.box_max = float(bounding_box[0]), float(bounding_box[1])
        self.tables = list(tables)                 # list of (T_l, F) float32 tables
        self.resolutions = list(resolutions)       # == floor(base_resolution * b**i)
        self.log2_hashmap_size = int(log2_hashmap_size)
        self.block_b = int(block_b)

        feat = self.tables[0].shape[1]
        for t in self.tables:
            assert t.shape[1] == feat, "all levels must share the feature dim"
            # hashed index <= (1<<log2)-1 must be a valid row (no OOB VMEM reads)
            assert (1 << self.log2_hashmap_size) <= t.shape[0], (
                "log2_hashmap_size too large for table with %d rows" % t.shape[0])
        # int32-wraparound hash == torch int64 hash only while the mask fits in 31 bits
        assert self.log2_hashmap_size <= 30

    def __call__(self, x):
        b = x.shape[0]
        n_levels = len(self.tables)
        feat = self.tables[0].shape[1]
        mask = (1 << self.log2_hashmap_size) - 1
        offs = jnp.array(_BOX_OFFSETS, dtype=jnp.int32)            # (8, 3)

        # --- vectorized glue: clamp, voxel index, corner hashes, interp weights ---
        xc = jnp.clip(x, self.box_min, self.box_max)
        h_levels, w_levels = [], []
        for resolution in self.resolutions:
            grid_size = (self.box_max - self.box_min) / float(resolution)
            idx = jnp.floor((xc - self.box_min) / grid_size).astype(jnp.int32)
            vmin = idx.astype(jnp.float32) * grid_size + self.box_min
            vmax = vmin + grid_size
            w_levels.append(((x - vmin) / (vmax - vmin)).astype(jnp.float32))   # (B, 3)
            vidx = idx[:, None, :] + offs[None, :, :]                            # (B, 8, 3)
            h = mask & ((vidx[..., 0] * _P1) ^ (vidx[..., 1] * _P2) ^ (vidx[..., 2] * _P3))
            h_levels.append(h.astype(jnp.int32))                                 # (B, 8)

        h_all = jnp.stack(h_levels, axis=1)        # (B, L, 8)
        w_all = jnp.stack(w_levels, axis=1)        # (B, L, 3)

        # --- pad batch to a multiple of block_b (no points dropped) ---
        block_b = max(8, min(self.block_b, _round_up(b, 8)))
        block_b = _round_up(block_b, 8)
        b_pad = _round_up(b, block_b)
        pad = b_pad - b
        if pad:
            h_all = jnp.pad(h_all, ((0, pad), (0, 0), (0, 0)))   # hash 0 -> valid row
            w_all = jnp.pad(w_all, ((0, pad), (0, 0), (0, 0)))
        nblocks = b_pad // block_b

        # hashes: (nblocks, block_b*L*8), element [blk, p*(L*8)+l*8+c]
        h_blocks = h_all.reshape(nblocks, block_b * n_levels * 8)

        # weights: (3, B_pad, L*F) with the per-level weight repeated over the F columns
        w_t = jnp.transpose(w_all, (2, 0, 1))                                   # (3, B_pad, L)
        w_exp = jnp.broadcast_to(w_t[..., None], (3, b_pad, n_levels, feat))
        w_exp = w_exp.reshape(3, b_pad, n_levels * feat).astype(jnp.float32)

        out = _fused_hash_grid(h_blocks, w_exp, self.tables,
                               block_b=block_b, n_levels=n_levels, feat=feat)
        return out[:b]


def _reference(x, tables, resolutions, box_min, box_max, log2_hashmap_size):
    """Pure-JAX reference mirroring the PyTorch forward semantics."""
    mask = (1 << log2_hashmap_size) - 1
    offs = jnp.array(_BOX_OFFSETS, dtype=jnp.int32)
    outs = []
    for table, resolution in zip(tables, resolutions):
        grid_size = (box_max - box_min) / float(resolution)
        xc = jnp.clip(x, box_min, box_max)
        idx = jnp.floor((xc - box_min) / grid_size).astype(jnp.int32)
        vmin = idx.astype(jnp.float32) * grid_size + box_min
        vmax = vmin + grid_size
        w = (x - vmin) / (vmax - vmin)
        vidx = idx[:, None, :] + offs[None, :, :]
        h = mask & ((vidx[..., 0] * _P1) ^ (vidx[..., 1] * _P2) ^ (vidx[..., 2] * _P3))
        e = table[h]                                   # (B, 8, F)
        w0, w1, w2 = w[:, 0:1], w[:, 1:2], w[:, 2:3]
        c00 = e[:, 0] * (1 - w0) + e[:, 4] * w0
        c01 = e[:, 1] * (1 - w0) + e[:, 5] * w0
        c10 = e[:, 2] * (1 - w0) + e[:, 6] * w0
        c11 = e[:, 3] * (1 - w0) + e[:, 7] * w0
        c0 = c00 * (1 - w1) + c10 * w1
        c1 = c01 * (1 - w1) + c11 * w1
        outs.append(c0 * (1 - w2) + c1 * w2)
    return jnp.concatenate(outs, axis=-1)


if __name__ == "__main__":
    key = jax.random.PRNGKey(0)
    B = 150                          # not a multiple of the block: exercises padding
    n_levels = 2
    n_features = 8
    resolutions = [16, 32]           # floor(base_resolution * b**i), base=16, b=2
    log2_hashmap_size = 12           # (1<<12) <= 16**3 <= 32**3
    bounding_box = (-1.0, 1.0)

    kx, kt = jax.random.split(key)
    x = jax.random.uniform(kx, (B, 3), jnp.float32, minval=-1.1, maxval=1.1)
    # nn.Embedding(res**3, F) with uniform init in [-1e-4, 1e-4]
    tables = [
        jax.random.uniform(jax.random.fold_in(kt, i),
                           (resolutions[i] ** 3, n_features),
                           jnp.float32, minval=-1e-4, maxval=1e-4)
        for i in range(n_levels)
    ]

    # small block_b for the demo so the padded/multi-block path is exercised;
    # production default is 256.
    embedder = GridEmbedder(bounding_box, tables, resolutions, log2_hashmap_size,
                            block_b=64)
    out = embedder(x)
    out = jax.block_until_ready(out)

    ref = _reference(x, tables, resolutions, bounding_box[0], bounding_box[1],
                     log2_hashmap_size)
    assert out.shape == (B, n_levels * n_features)
    np.testing.assert_allclose(np.asarray(out), np.asarray(ref),
                               rtol=1e-5, atol=1e-9)
    print("KERNEL_OK")
</pallas_src>

<mosaic_0001>
module attributes {stable_mosaic.version = 11 : i64} {
  func.func @kernel(%arg0: i32, %arg1: memref<3x1024xi32, #tpu.memory_space<any>>, %arg2: memref<3x64x16xf32, #tpu.memory_space<vmem>>, %arg3: memref<4096x8xf32, #tpu.memory_space<vmem>>, %arg4: memref<32768x8xf32, #tpu.memory_space<vmem>>, %arg5: memref<64x16xf32, #tpu.memory_space<vmem>>, %arg6: memref<1024xi32, #tpu.memory_space<smem>>, %arg7: memref<!tpu.dma_semaphore, #tpu.memory_space<semaphore_mem>>, %arg8: memref<512x16xf32, #tpu.memory_space<vmem>>) attributes {dimension_semantics = [#tpu.dimension_semantics<parallel>], iteration_bounds = array<i64: 3>, scalar_prefetch = 0 : i64, scratch_operands = 3 : i64, tpu.core_type = #tpu.core_type<tc>, window_params = [{}, {transform_indices = @transform_1, window_bounds = array<i64: 3, 64, 16>}, {pipeline_mode = #tpu.pipeline_mode<synchronous>, transform_indices = @transform_2, window_bounds = array<i64: 4096, 8>}, {pipeline_mode = #tpu.pipeline_mode<synchronous>, transform_indices = @transform_3, window_bounds = array<i64: 32768, 8>}, {transform_indices = @transform_4, window_bounds = array<i64: 64, 16>}]} {
    %c0_i32 = arith.constant 0 : i32
    %0 = tpu.memref_slice %arg1[%arg0, %c0_i32] : memref<3x1024xi32, #tpu.memory_space<any>> -> memref<1x1024xi32, #tpu.memory_space<any>>
    %1 = tpu.memref_squeeze %0 : memref<1x1024xi32, #tpu.memory_space<any>> -> memref<1024xi32, #tpu.memory_space<any>>
    tpu.enqueue_dma source(%1 : memref<1024xi32, #tpu.memory_space<any>>) target(%arg6 : memref<1024xi32, #tpu.memory_space<smem>>) target_semaphore(%arg7 : memref<!tpu.dma_semaphore, #tpu.memory_space<semaphore_mem>>)
    %c0_i32_0 = arith.constant 0 : i32
    %2 = tpu.memref_slice %arg1[%arg0, %c0_i32_0] : memref<3x1024xi32, #tpu.memory_space<any>> -> memref<1x1024xi32, #tpu.memory_space<any>>
    %3 = tpu.memref_squeeze %2 : memref<1x1024xi32, #tpu.memory_space<any>> -> memref<1024xi32, #tpu.memory_space<any>>
    tpu.wait_dma2 semaphore(%arg7 : memref<!tpu.dma_semaphore, #tpu.memory_space<semaphore_mem>>) src(%3 : memref<1024xi32, #tpu.memory_space<any>>) dst(%arg6 : memref<1024xi32, #tpu.memory_space<smem>>)
    %c0_i32_1 = arith.constant 0 : i32
    %c64_i32 = arith.constant 64 : i32
    %4 = arith.addi %c0_i32_1, %c64_i32 : i32
    %c1_i32 = arith.constant 1 : i32
    scf.for %arg9 = %c0_i32_1 to %4 step %c1_i32  : i32 {
      %c16_i32 = arith.constant 16 : i32
      %55 = arith.muli %arg9, %c16_i32 : i32
      %c0_i32_26 = arith.constant 0 : i32
      %56 = arith.addi %55, %c0_i32_26 : i32
      %c0_i32_27 = arith.constant 0 : i32
      %57 = arith.addi %56, %c0_i32_27 : i32
      %58 = arith.index_cast %57 : i32 to index
      %59 = memref.load %arg6[%58] : memref<1024xi32, #tpu.memory_space<smem>>
      %60 = arith.index_cast %59 : i32 to index
      %c0_28 = arith.constant 0 : index
      %61 = vector.load %arg3[%60, %c0_28] : memref<4096x8xf32, #tpu.memory_space<vmem>>, vector<1x8xf32>
      %c0_i32_29 = arith.constant 0 : i32
      %62 = arith.addi %c0_i32_29, %arg9 : i32
      %63 = arith.index_cast %62 : i32 to index
      %c0_30 = arith.constant 0 : index
      %64 = vector.load %arg8[%63, %c0_30] : memref<512x16xf32, #tpu.memory_space<vmem>>, vector<1x8xf32>
      tpu.vector_store %arg8[%63, %c0_30], %61 {strides = array<i32>} : memref<512x16xf32, #tpu.memory_space<vmem>>, vector<1x8xf32>,
      %c0_i32_31 = arith.constant 0 : i32
      %65 = arith.addi %55, %c0_i32_31 : i32
      %c1_i32_32 = arith.constant 1 : i32
      %66 = arith.addi %65, %c1_i32_32 : i32
      %67 = arith.index_cast %66 : i32 to index
      %68 = memref.load %arg6[%67] : memref<1024xi32, #tpu.memory_space<smem>>
      %69 = arith.index_cast %68 : i32 to index
      %c0_33 = arith.constant 0 : index
      %70 = vector.load %arg3[%69, %c0_33] : memref<4096x8xf32, #tpu.memory_space<vmem>>, vector<1x8xf32>
      %c64_i32_34 = arith.constant 64 : i32
      %71 = arith.addi %c64_i32_34, %arg9 : i32
      %72 = arith.index_cast %71 : i32 to index
      %c0_35 = arith.constant 0 : index
      %73 = vector.load %arg8[%72, %c0_35] : memref<512x16xf32, #tpu.memory_space<vmem>>, vector<1x8xf32>
      tpu.vector_store %arg8[%72, %c0_35], %70 {strides = array<i32>} : memref<512x16xf32, #tpu.memory_space<vmem>>, vector<1x8xf32>,
      %c0_i32_36 = arith.constant 0 : i32
      %74 = arith.addi %55, %c0_i32_36 : i32
      %c2_i32 = arith.constant 2 : i32
      %75 = arith.addi %74, %c2_i32 : i32
      %76 = arith.index_cast %75 : i32 to index
      %77 = memref.load %arg6[%76] : memref<1024xi32, #tpu.memory_space<smem>>
      %78 = arith.index_cast %77 : i32 to index
      %c0_37 = arith.constant 0 : index
      %79 = vector.load %arg3[%78, %c0_37] : memref<4096x8xf32, #tpu.memory_space<vmem>>, vector<1x8xf32>
      %c128_i32 = arith.constant 128 : i32
      %80 = arith.addi %c128_i32, %arg9 : i32
      %81 = arith.index_cast %80 : i32 to index
      %c0_38 = arith.constant 0 : index
      %82 = vector.load %arg8[%81, %c0_38] : memref<512x16xf32, #tpu.memory_space<vmem>>, vector<1x8xf32>
      tpu.vector_store %arg8[%81, %c0_38], %79 {strides = array<i32>} : memref<512x16xf32, #tpu.memory_space<vmem>>, vector<1x8xf32>,
      %c0_i32_39 = arith.constant 0 : i32
      %83 = arith.addi %55, %c0_i32_39 : i32
      %c3_i32 = arith.constant 3 : i32
      %84 = arith.addi %83, %c3_i32 : i32
      %85 = arith.index_cast %84 : i32 to index
      %86 = memref.load %arg6[%85] : memref<1024xi32, #tpu.memory_space<smem>>
      %87 = arith.index_cast %86 : i32 to index
      %c0_40 = arith.constant 0 : index
      %88 = vector.load %arg3[%87, %c0_40] : memref<4096x8xf32, #tpu.memory_space<vmem>>, vector<1x8xf32>
      %c192_i32 = arith.constant 192 : i32
      %89 = arith.addi %c192_i32, %arg9 : i32
      %90 = arith.index_cast %89 : i32 to index
      %c0_41 = arith.constant 0 : index
      %91 = vector.load %arg8[%90, %c0_41] : memref<512x16xf32, #tpu.memory_space<vmem>>, vector<1x8xf32>
      tpu.vector_store %arg8[%90, %c0_41], %88 {strides = array<i32>} : memref<512x16xf32, #tpu.memory_space<vmem>>, vector<1x8xf32>,
      %c0_i32_42 = arith.constant 0 : i32
      %92 = arith.addi %55, %c0_i32_42 : i32
      %c4_i32 = arith.constant 4 : i32
      %93 = arith.addi %92, %c4_i32 : i32
      %94 = arith.index_cast %93 : i32 to index
      %95 = memref.load %arg6[%94] : memref<1024xi32, #tpu.memory_space<smem>>
      %96 = arith.index_cast %95 : i32 to index
      %c0_43 = arith.constant 0 : index
      %97 = vector.load %arg3[%96, %c0_43] : memref<4096x8xf32, #tpu.memory_space<vmem>>, vector<1x8xf32>
      %c256_i32 = arith.constant 256 : i32
      %98 = arith.addi %c256_i32, %arg9 : i32
      %99 = arith.index_cast %98 : i32 to index
      %c0_44 = arith.constant 0 : index
      %100 = vector.load %arg8[%99, %c0_44] : memref<512x16xf32, #tpu.memory_space<vmem>>, vector<1x8xf32>
      tpu.vector_store %arg8[%99, %c0_44], %97 {strides = array<i32>} : memref<512x16xf32, #tpu.memory_space<vmem>>, vector<1x8xf32>,
      %c0_i32_45 = arith.constant 0 : i32
      %101 = arith.addi %55, %c0_i32_45 : i32
      %c5_i32 = arith.constant 5 : i32
      %102 = arith.addi %101, %c5_i32 : i32
      %103 = arith.index_cast %102 : i32 to index
      %104 = memref.load %arg6[%103] : memref<1024xi32, #tpu.memory_space<smem>>
      %105 = arith.index_cast %104 : i32 to index
      %c0_46 = arith.constant 0 : index
      %106 = vector.load %arg3[%105, %c0_46] : memref<4096x8xf32, #tpu.memory_space<vmem>>, vector<1x8xf32>
      %c320_i32 = arith.constant 320 : i32
      %107 = arith.addi %c320_i32, %arg9 : i32
      %108 = arith.index_cast %107 : i32 to index
      %c0_47 = arith.constant 0 : index
      %109 = vector.load %arg8[%108, %c0_47] : memref<512x16xf32, #tpu.memory_space<vmem>>, vector<1x8xf32>
      tpu.vector_store %arg8[%108, %c0_47], %106 {strides = array<i32>} : memref<512x16xf32, #tpu.memory_space<vmem>>, vector<1x8xf32>,
      %c0_i32_48 = arith.constant 0 : i32
      %110 = arith.addi %55, %c0_i32_48 : i32
      %c6_i32 = arith.constant 6 : i32
      %111 = arith.addi %110, %c6_i32 : i32
      %112 = arith.index_cast %111 : i32 to index
      %113 = memref.load %arg6[%112] : memref<1024xi32, #tpu.memory_space<smem>>
      %114 = arith.index_cast %113 : i32 to index
      %c0_49 = arith.constant 0 : index
      %115 = vector.load %arg3[%114, %c0_49] : memref<4096x8xf32, #tpu.memory_space<vmem>>, vector<1x8xf32>
      %c384_i32 = arith.constant 384 : i32
      %116 = arith.addi %c384_i32, %arg9 : i32
      %117 = arith.index_cast %116 : i32 to index
      %c0_50 = arith.constant 0 : index
      %118 = vector.load %arg8[%117, %c0_50] : memref<512x16xf32, #tpu.memory_space<vmem>>, vector<1x8xf32>
      tpu.vector_store %arg8[%117, %c0_50], %115 {strides = array<i32>} : memref<512x16xf32, #tpu.memory_space<vmem>>, vector<1x8xf32>,
      %c0_i32_51 = arith.constant 0 : i32
      %119 = arith.addi %55, %c0_i32_51 : i32
      %c7_i32 = arith.constant 7 : i32
      %120 = arith.addi %119, %c7_i32 : i32
      %121 = arith.index_cast %120 : i32 to index
      %122 = memref.load %arg6[%121] : memref<1024xi32, #tpu.memory_space<smem>>
      %123 = arith.index_cast %122 : i32 to index
      %c0_52 = arith.constant 0 : index
      %124 = vector.load %arg3[%123, %c0_52] : memref<4096x8xf32, #tpu.memory_space<vmem>>, vector<1x8xf32>
      %c448_i32 = arith.constant 448 : i32
      %125 = arith.addi %c448_i32, %arg9 : i32
      %126 = arith.index_cast %125 : i32 to index
      %c0_53 = arith.constant 0 : index
      %127 = vector.load %arg8[%126, %c0_53] : memref<512x16xf32, #tpu.memory_space<vmem>>, vector<1x8xf32>
      tpu.vector_store %arg8[%126, %c0_53], %124 {strides = array<i32>} : memref<512x16xf32, #tpu.memory_space<vmem>>, vector<1x8xf32>,
      %c8_i32 = arith.constant 8 : i32
      %128 = arith.addi %55, %c8_i32 : i32
      %c0_i32_54 = arith.constant 0 : i32
      %129 = arith.addi %128, %c0_i32_54 : i32
      %130 = arith.index_cast %129 : i32 to index
      %131 = memref.load %arg6[%130] : memref<1024xi32, #tpu.memory_space<smem>>
      %132 = arith.index_cast %131 : i32 to index
      %c0_55 = arith.constant 0 : index
      %133 = vector.load %arg4[%132, %c0_55] : memref<32768x8xf32, #tpu.memory_space<vmem>>, vector<1x8xf32>
      %c0_i32_56 = arith.constant 0 : i32
      %134 = arith.addi %c0_i32_56, %arg9 : i32
      %135 = arith.index_cast %134 : i32 to index
      %c8 = arith.constant 8 : index
      %136 = vector.load %arg8[%135, %c8] : memref<512x16xf32, #tpu.memory_space<vmem>>, vector<1x8xf32>
      tpu.vector_store %arg8[%135, %c8], %133 {strides = array<i32>} : memref<512x16xf32, #tpu.memory_space<vmem>>, vector<1x8xf32>,
      %c8_i32_57 = arith.constant 8 : i32
      %137 = arith.addi %55, %c8_i32_57 : i32
      %c1_i32_58 = arith.constant 1 : i32
      %138 = arith.addi %137, %c1_i32_58 : i32
      %139 = arith.index_cast %138 : i32 to index
      %140 = memref.load %arg6[%139] : memref<1024xi32, #tpu.memory_space<smem>>
      %141 = arith.index_cast %140 : i32 to index
      %c0_59 = arith.constant 0 : index
      %142 = vector.load %arg4[%141, %c0_59] : memref<32768x8xf32, #tpu.memory_space<vmem>>, vector<1x8xf32>
      %c64_i32_60 = arith.constant 64 : i32
      %143 = arith.addi %c64_i32_60, %arg9 : i32
      %144 = arith.index_cast %143 : i32 to index
      %c8_61 = arith.constant 8 : index
      %145 = vector.load %arg8[%144, %c8_61] : memref<512x16xf32, #tpu.memory_space<vmem>>, vector<1x8xf32>
      tpu.vector_store %arg8[%144, %c8_61], %142 {strides = array<i32>} : memref<512x16xf32, #tpu.memory_space<vmem>>, vector<1x8xf32>,
      %c8_i32_62 = arith.constant 8 : i32
      %146 = arith.addi %55, %c8_i32_62 : i32
      %c2_i32_63 = arith.constant 2 : i32
      %147 = arith.addi %146, %c2_i32_63 : i32
      %148 = arith.index_cast %147 : i32 to index
      %149 = memref.load %arg6[%148] : memref<1024xi32, #tpu.memory_space<smem>>
      %150 = arith.index_cast %149 : i32 to index
      %c0_64 = arith.constant 0 : index
      %151 = vector.load %arg4[%150, %c0_64] : memref<32768x8xf32, #tpu.memory_space<vmem>>, vector<1x8xf32>
      %c128_i32_65 = arith.constant 128 : i32
      %152 = arith.addi %c128_i32_65, %arg9 : i32
      %153 = arith.index_cast %152 : i32 to index
      %c8_66 = arith.constant 8 : index
      %154 = vector.load %arg8[%153, %c8_66] : memref<512x16xf32, #tpu.memory_space<vmem>>, vector<1x8xf32>
      tpu.vector_store %arg8[%153, %c8_66], %151 {strides = array<i32>} : memref<512x16xf32, #tpu.memory_space<vmem>>, vector<1x8xf32>,
      %c8_i32_67 = arith.constant 8 : i32
      %155 = arith.addi %55, %c8_i32_67 : i32
      %c3_i32_68 = arith.constant 3 : i32
      %156 = arith.addi %155, %c3_i32_68 : i32
      %157 = arith.index_cast %156 : i32 to index
      %158 = memref.load %arg6[%157] : memref<1024xi32, #tpu.memory_space<smem>>
      %159 = arith.index_cast %158 : i32 to index
      %c0_69 = arith.constant 0 : index
      %160 = vector.load %arg4[%159, %c0_69] : memref<32768x8xf32, #tpu.memory_space<vmem>>, vector<1x8xf32>
      %c192_i32_70 = arith.constant 192 : i32
      %161 = arith.addi %c192_i32_70, %arg9 : i32
      %162 = arith.index_cast %161 : i32 to index
      %c8_71 = arith.constant 8 : index
      %163 = vector.load %arg8[%162, %c8_71] : memref<512x16xf32, #tpu.memory_space<vmem>>, vector<1x8xf32>
      tpu.vector_store %arg8[%162, %c8_71], %160 {strides = array<i32>} : memref<512x16xf32, #tpu.memory_space<vmem>>, vector<1x8xf32>,
      %c8_i32_72 = arith.constant 8 : i32
      %164 = arith.addi %55, %c8_i32_72 : i32
      %c4_i32_73 = arith.constant 4 : i32
      %165 = arith.addi %164, %c4_i32_73 : i32
      %166 = arith.index_cast %165 : i32 to index
      %167 = memref.load %arg6[%166] : memref<1024xi32, #tpu.memory_space<smem>>
      %168 = arith.index_cast %167 : i32 to index
      %c0_74 = arith.constant 0 : index
      %169 = vector.load %arg4[%168, %c0_74] : memref<32768x8xf32, #tpu.memory_space<vmem>>, vector<1x8xf32>
      %c256_i32_75 = arith.constant 256 : i32
      %170 = arith.addi %c256_i32_75, %arg9 : i32
      %171 = arith.index_cast %170 : i32 to index
      %c8_76 = arith.constant 8 : index
      %172 = vector.load %arg8[%171, %c8_76] : memref<512x16xf32, #tpu.memory_space<vmem>>, vector<1x8xf32>
      tpu.vector_store %arg8[%171, %c8_76], %169 {strides = array<i32>} : memref<512x16xf32, #tpu.memory_space<vmem>>, vector<1x8xf32>,
      %c8_i32_77 = arith.constant 8 : i32
      %173 = arith.addi %55, %c8_i32_77 : i32
      %c5_i32_78 = arith.constant 5 : i32
      %174 = arith.addi %173, %c5_i32_78 : i32
      %175 = arith.index_cast %174 : i32 to index
      %176 = memref.load %arg6[%175] : memref<1024xi32, #tpu.memory_space<smem>>
      %177 = arith.index_cast %176 : i32 to index
      %c0_79 = arith.constant 0 : index
      %178 = vector.load %arg4[%177, %c0_79] : memref<32768x8xf32, #tpu.memory_space<vmem>>, vector<1x8xf32>
      %c320_i32_80 = arith.constant 320 : i32
      %179 = arith.addi %c320_i32_80, %arg9 : i32
      %180 = arith.index_cast %179 : i32 to index
      %c8_81 = arith.constant 8 : index
      %181 = vector.load %arg8[%180, %c8_81] : memref<512x16xf32, #tpu.memory_space<vmem>>, vector<1x8xf32>
      tpu.vector_store %arg8[%180, %c8_81], %178 {strides = array<i32>} : memref<512x16xf32, #tpu.memory_space<vmem>>, vector<1x8xf32>,
      %c8_i32_82 = arith.constant 8 : i32
      %182 = arith.addi %55, %c8_i32_82 : i32
      %c6_i32_83 = arith.constant 6 : i32
      %183 = arith.addi %182, %c6_i32_83 : i32
      %184 = arith.index_cast %183 : i32 to index
      %185 = memref.load %arg6[%184] : memref<1024xi32, #tpu.memory_space<smem>>
      %186 = arith.index_cast %185 : i32 to index
      %c0_84 = arith.constant 0 : index
      %187 = vector.load %arg4[%186, %c0_84] : memref<32768x8xf32, #tpu.memory_space<vmem>>, vector<1x8xf32>
      %c384_i32_85 = arith.constant 384 : i32
      %188 = arith.addi %c384_i32_85, %arg9 : i32
      %189 = arith.index_cast %188 : i32 to index
      %c8_86 = arith.constant 8 : index
      %190 = vector.load %arg8[%189, %c8_86] : memref<512x16xf32, #tpu.memory_space<vmem>>, vector<1x8xf32>
      tpu.vector_store %arg8[%189, %c8_86], %187 {strides = array<i32>} : memref<512x16xf32, #tpu.memory_space<vmem>>, vector<1x8xf32>,
      %c8_i32_87 = arith.constant 8 : i32
      %191 = arith.addi %55, %c8_i32_87 : i32
      %c7_i32_88 = arith.constant 7 : i32
      %192 = arith.addi %191, %c7_i32_88 : i32
      %193 = arith.index_cast %192 : i32 to index
      %194 = memref.load %arg6[%193] : memref<1024xi32, #tpu.memory_space<smem>>
      %195 = arith.index_cast %194 : i32 to index
      %c0_89 = arith.constant 0 : index
      %196 = vector.load %arg4[%195, %c0_89] : memref<32768x8xf32, #tpu.memory_space<vmem>>, vector<1x8xf32>
      %c448_i32_90 = arith.constant 448 : i32
      %197 = arith.addi %c448_i32_90, %arg9 : i32
      %198 = arith.index_cast %197 : i32 to index
      %c8_91 = arith.constant 8 : index
      %199 = vector.load %arg8[%198, %c8_91] : memref<512x16xf32, #tpu.memory_space<vmem>>, vector<1x8xf32>
      tpu.vector_store %arg8[%198, %c8_91], %196 {strides = array<i32>} : memref<512x16xf32, #tpu.memory_space<vmem>>, vector<1x8xf32>,
    }
    %c64_i32_2 = arith.constant 64 : i32
    %c0 = arith.constant 0 : index
    %c0_3 = arith.constant 0 : index
    %c0_4 = arith.constant 0 : index
    %5 = vector.load %arg2[%c0, %c0_3, %c0_4] : memref<3x64x16xf32, #tpu.memory_space<vmem>>, vector<1x64x16xf32>
    %6 = vector.shape_cast %5 : vector<1x64x16xf32> to vector<64x16xf32>
    %c1 = arith.constant 1 : index
    %c0_5 = arith.constant 0 : index
    %c0_6 = arith.constant 0 : index
    %7 = vector.load %arg2[%c1, %c0_5, %c0_6] : memref<3x64x16xf32, #tpu.memory_space<vmem>>, vector<1x64x16xf32>
    %8 = vector.shape_cast %7 : vector<1x64x16xf32> to vector<64x16xf32>
    %c2 = arith.constant 2 : index
    %c0_7 = arith.constant 0 : index
    %c0_8 = arith.constant 0 : index
    %9 = vector.load %arg2[%c2, %c0_7, %c0_8] : memref<3x64x16xf32, #tpu.memory_space<vmem>>, vector<1x64x16xf32>
    %10 = vector.shape_cast %9 : vector<1x64x16xf32> to vector<64x16xf32>
    %c0_9 = arith.constant 0 : index
    %c0_10 = arith.constant 0 : index
    %11 = vector.load %arg8[%c0_9, %c0_10] : memref<512x16xf32, #tpu.memory_space<vmem>>, vector<64x16xf32>
    %c64 = arith.constant 64 : index
    %c0_11 = arith.constant 0 : index
    %12 = vector.load %arg8[%c64, %c0_11] : memref<512x16xf32, #tpu.memory_space<vmem>>, vector<64x16xf32>
    %c128 = arith.constant 128 : index
    %c0_12 = arith.constant 0 : index
    %13 = vector.load %arg8[%c128, %c0_12] : memref<512x16xf32, #tpu.memory_space<vmem>>, vector<64x16xf32>
    %c192 = arith.constant 192 : index
    %c0_13 = arith.constant 0 : index
    %14 = vector.load %arg8[%c192, %c0_13] : memref<512x16xf32, #tpu.memory_space<vmem>>, vector<64x16xf32>
    %c256 = arith.constant 256 : index
    %c0_14 = arith.constant 0 : index
    %15 = vector.load %arg8[%c256, %c0_14] : memref<512x16xf32, #tpu.memory_space<vmem>>, vector<64x16xf32>
    %c320 = arith.constant 320 : index
    %c0_15 = arith.constant 0 : index
    %16 = vector.load %arg8[%c320, %c0_15] : memref<512x16xf32, #tpu.memory_space<vmem>>, vector<64x16xf32>
    %c384 = arith.constant 384 : index
    %c0_16 = arith.constant 0 : index
    %17 = vector.load %arg8[%c384, %c0_16] : memref<512x16xf32, #tpu.memory_space<vmem>>, vector<64x16xf32>
    %c448 = arith.constant 448 : index
    %c0_17 = arith.constant 0 : index
    %18 = vector.load %arg8[%c448, %c0_17] : memref<512x16xf32, #tpu.memory_space<vmem>>, vector<64x16xf32>
    %cst = arith.constant 1.000000e+00 : f32
    %19 = vector.broadcast %cst : f32 to vector<64x16xf32>
    %20 = arith.subf %19, %6 : vector<64x16xf32>
    %21 = arith.mulf %11, %20 : vector<64x16xf32>
    %22 = arith.mulf %15, %6 : vector<64x16xf32>
    %23 = arith.addf %21, %22 : vector<64x16xf32>
    %cst_18 = arith.constant 1.000000e+00 : f32
    %24 = vector.broadcast %cst_18 : f32 to vector<64x16xf32>
    %25 = arith.subf %24, %6 : vector<64x16xf32>
    %26 = arith.mulf %12, %25 : vector<64x16xf32>
    %27 = arith.mulf %16, %6 : vector<64x16xf32>
    %28 = arith.addf %26, %27 : vector<64x16xf32>
    %cst_19 = arith.constant 1.000000e+00 : f32
    %29 = vector.broadcast %cst_19 : f32 to vector<64x16xf32>
    %30 = arith.subf %29, %6 : vector<64x16xf32>
    %31 = arith.mulf %13, %30 : vector<64x16xf32>
    %32 = arith.mulf %17, %6 : vector<64x16xf32>
    %33 = arith.addf %31, %32 : vector<64x16xf32>
    %cst_20 = arith.constant 1.000000e+00 : f32
    %34 = vector.broadcast %cst_20 : f32 to vector<64x16xf32>
    %35 = arith.subf %34, %6 : vector<64x16xf32>
    %36 = arith.mulf %14, %35 : vector<64x16xf32>
    %37 = arith.mulf %18, %6 : vector<64x16xf32>
    %38 = arith.addf %36, %37 : vector<64x16xf32>
    %cst_21 = arith.constant 1.000000e+00 : f32
    %39 = vector.broadcast %cst_21 : f32 to vector<64x16xf32>
    %40 = arith.subf %39, %8 : vector<64x16xf32>
    %41 = arith.mulf %23, %40 : vector<64x16xf32>
    %42 = arith.mulf %33, %8 : vector<64x16xf32>
    %43 = arith.addf %41, %42 : vector<64x16xf32>
    %cst_22 = arith.constant 1.000000e+00 : f32
    %44 = vector.broadcast %cst_22 : f32 to vector<64x16xf32>
    %45 = arith.subf %44, %8 : vector<64x16xf32>
    %46 = arith.mulf %28, %45 : vector<64x16xf32>
    %47 = arith.mulf %38, %8 : vector<64x16xf32>
    %48 = arith.addf %46, %47 : vector<64x16xf32>
    %cst_23 = arith.constant 1.000000e+00 : f32
    %49 = vector.broadcast %cst_23 : f32 to vector<64x16xf32>
    %50 = arith.subf %49, %10 : vector<64x16xf32>
    %51 = arith.mulf %43, %50 : vector<64x16xf32>
    %52 = arith.mulf %48, %10 : vector<64x16xf32>
    %53 = arith.addf %51, %52 : vector<64x16xf32>
    %c0_24 = arith.constant 0 : index
    %c0_25 = arith.constant 0 : index
    %54 = vector.load %arg5[%c0_24, %c0_25] : memref<64x16xf32, #tpu.memory_space<vmem>>, vector<64x16xf32>
    tpu.vector_store %arg5[%c0_24, %c0_25], %53 {strides = array<i32>} : memref<64x16xf32, #tpu.memory_space<vmem>>, vector<64x16xf32>,
    return
  }
  func.func @transform_1(%arg0: i32) -> (i32, i32, i32) {
    %c0_i32 = arith.constant 0 : i32
    %c0_i32_0 = arith.constant 0 : i32
    %c0_i32_1 = arith.constant 0 : i32
    return %c0_i32, %arg0, %c0_i32_0 : i32, i32, i32
  }
  func.func @transform_2(%arg0: i32) -> (i32, i32) {
    %c0_i32 = arith.constant 0 : i32
    %c0_i32_0 = arith.constant 0 : i32
    %c0_i32_1 = arith.constant 0 : i32
    return %c0_i32, %c0_i32_0 : i32, i32
  }
  func.func @transform_3(%arg0: i32) -> (i32, i32) {
    %c0_i32 = arith.constant 0 : i32
    %c0_i32_0 = arith.constant 0 : i32
    %c0_i32_1 = arith.constant 0 : i32
    return %c0_i32, %c0_i32_0 : i32, i32
  }
  func.func @transform_4(%arg0: i32) -> (i32, i32) {
    %c0_i32 = arith.constant 0 : i32
    %c0_i32_0 = arith.constant 0 : i32
    return %arg0, %c0_i32 : i32, i32
  }
}

</mosaic_0001>

<bundles_post_ra>
// kernel: tpu_custom_call.1
= control target key start
LH: loop header
LB: loop body
LE: loop exit
PB: predicated region body
PF: predicated region fallthrough
CT: control target
= control target key end

     0   :  { %s1300_s0 = inlined_call_operand.vmem [shape: s32[3,1024], index: 0, kind: input, shape index: {}]   ;;  %s1301_s1 = inlined_call_operand.vmem [shape: f32[3,192,16], index: 1, kind: input, shape index: {}]   ;;  %s1302_s2 = inlined_call_operand.vmem [shape: f32[4096,8], index: 2, kind: input, shape index: {}]   ;;  %s1303_s3 = inlined_call_operand.vmem [shape: f32[32768,8], index: 3, kind: input, shape index: {}]   ;;  %s1304_s4 = inlined_call_operand.vmem [shape: f32[192,16], index: 4, kind: output, shape index: {}]  }
   0x1   :  { %1305 = sst [smem:[#allocation8_spill]] %s1300_s0 }
   0x2   :  { %1306 = sst [smem:[#allocation9_spill]] %s1301_s1 }
   0x3   :  { %s1008_s15 = smov 0   ;;  %s1010_s16 = smov 0  }
   0x4   :  { %s1012_s17 = smov 0  }
   0x5 LB: > { %s1024_s18 = sadd.s32 4294967295, %s972_s17   ;;  %s1027_s19 = sadd.s32 1, %s972_s17   ;;  %s972_s17 = sphi %s1012_s17, %s1311_s17   ;;  %s968_s16 = sphi %s1010_s16, %s1310_s16   ;;  %s964_s15 = sphi %s1008_s15, %s1309_s15  }
   0x6   : > { %s18_s20 = ssub.s32 %s972_s17, %s1027_s19  ;;  %s21_s21 = sadd.s32 1, %s968_s16 }
   0x7   : > { %p19_p0 = scmp.eq.s32.totalorder %s18_s20, 0  ;;  %p28_p1 = scmp.ne.s32.totalorder %s968_s16, %s964_s15 }
   0x8   : > { %p29_p2 = scmp.eq.s32.totalorder %s972_s17, 0  ;;  %p851_p4 = scmp.ge.s32.totalorder %s972_s17, 3 }
   0x9   : > { %s1036_s22 = scalar_select %p19_p0, %s968_s16, %s21_s21  }
   0xa   : > { %p30_p3 = por %p29_p2, %p28_p1  ;;  %128 = sbr.rel (%p851_p4) target bundleno = 38 (0x26), region = 24 }
   0xf   : > { %131 = sbr.rel (!%p30_p3) target bundleno = 38 (0x26), region = 28  ;;  %s133_s23 = sand.u32 (%p30_p3), 1, %s968_s16  }
  0x10   : > { %s892_s24 = sshll.u32 (%p30_p3), %s972_s17, 6  ;;  %s893_s25 = smul.u32 (%p30_p3), 192, %s133_s23 }
  0x11   : > { %s1307_s1 = sld [smem:[#allocation9_spill]] (%p30_p3) }
  0x12   : > { %s1052_s29 = scalar_lea.vmem (%p30_p3), [#allocation5], %s893_s25 }
  0x17   : > { %s1044_s28 = scalar_lea.vmem %s1307_s1, %s892_s24 }
  0x18   : > { %v213_v0 = vld [vmem:[%s1044_s28] sm:$0xff]  ;;  %v215_v1 = vld [vmem:[%s1044_s28 + $0x8] sm:$0xff]  ;;  %v217_v2 = vld [vmem:[%s1044_s28 + $0x10] sm:$0xff] }
  0x19   : > { %v219_v3 = vld [vmem:[%s1044_s28 + $0x18] sm:$0xff]  ;;  %v221_v4 = vld [vmem:[%s1044_s28 + $0x20] sm:$0xff]  ;;  %v223_v5 = vld [vmem:[%s1044_s28 + $0x28] sm:$0xff]  ;;  %214 = vst [vmem:[%s1052_s29] sm:$0xff] %v213_v0 }
  0x1a   : > { %216 = vst [vmem:[%s1052_s29 + $0x8] sm:$0xff] %v215_v1  ;;  %218 = vst [vmem:[%s1052_s29 + $0x10] sm:$0xff] %v217_v2  ;;  %v225_v6 = vld [vmem:[%s1044_s28 + $0x30] sm:$0xff]  ;;  %v227_v7 = vld [vmem:[%s1044_s28 + $0x38] sm:$0xff] }
  0x1b   : > { %220 = vst [vmem:[%s1052_s29 + $0x18] sm:$0xff] %v219_v3  ;;  %222 = vst [vmem:[%s1052_s29 + $0x20] sm:$0xff] %v221_v4  ;;  %v229_v8 = vld [vmem:[%s1044_s28 + $0xc0] sm:$0xff]  ;;  %v231_v9 = vld [vmem:[%s1044_s28 + $0xc8] sm:$0xff] }
  0x1c   : > { %224 = vst [vmem:[%s1052_s29 + $0x28] sm:$0xff] %v223_v5  ;;  %226 = vst [vmem:[%s1052_s29 + $0x30] sm:$0xff] %v225_v6  ;;  %v233_v10 = vld [vmem:[%s1044_s28 + $0xd0] sm:$0xff]  ;;  %v235_v11 = vld [vmem:[%s1044_s28 + $0xd8] sm:$0xff] }
  0x1d   : > { %228 = vst [vmem:[%s1052_s29 + $0x38] sm:$0xff] %v227_v7  ;;  %230 = vst [vmem:[%s1052_s29 + $0x40] sm:$0xff] %v229_v8  ;;  %v237_v12 = vld [vmem:[%s1044_s28 + $0xe0] sm:$0xff]  ;;  %v239_v13 = vld [vmem:[%s1044_s28 + $0xe8] sm:$0xff] }
  0x1e   : > { %232 = vst [vmem:[%s1052_s29 + $0x48] sm:$0xff] %v231_v9  ;;  %234 = vst [vmem:[%s1052_s29 + $0x50] sm:$0xff] %v233_v10  ;;  %v241_v14 = vld [vmem:[%s1044_s28 + $0xf0] sm:$0xff]  ;;  %v243_v15 = vld [vmem:[%s1044_s28 + $0xf8] sm:$0xff] }
  0x1f   : > { %236 = vst [vmem:[%s1052_s29 + $0x58] sm:$0xff] %v235_v11  ;;  %238 = vst [vmem:[%s1052_s29 + $0x60] sm:$0xff] %v237_v12  ;;  %v245_v16 = vld [vmem:[%s1044_s28 + $0x180] sm:$0xff]  ;;  %v247_v17 = vld [vmem:[%s1044_s28 + $0x188] sm:$0xff] }
  0x20   : > { %240 = vst [vmem:[%s1052_s29 + $0x68] sm:$0xff] %v239_v13  ;;  %242 = vst [vmem:[%s1052_s29 + $0x70] sm:$0xff] %v241_v14  ;;  %v249_v18 = vld [vmem:[%s1044_s28 + $0x190] sm:$0xff]  ;;  %v251_v19 = vld [vmem:[%s1044_s28 + $0x198] sm:$0xff] }
  0x21   : > { %244 = vst [vmem:[%s1052_s29 + $0x78] sm:$0xff] %v243_v15  ;;  %246 = vst [vmem:[%s1052_s29 + $0x80] sm:$0xff] %v245_v16  ;;  %v253_v20 = vld [vmem:[%s1044_s28 + $0x1a0] sm:$0xff]  ;;  %v255_v21 = vld [vmem:[%s1044_s28 + $0x1a8] sm:$0xff] }
  0x22   : > { %248 = vst [vmem:[%s1052_s29 + $0x88] sm:$0xff] %v247_v17  ;;  %250 = vst [vmem:[%s1052_s29 + $0x90] sm:$0xff] %v249_v18  ;;  %v257_v22 = vld [vmem:[%s1044_s28 + $0x1b0] sm:$0xff]  ;;  %v259_v23 = vld [vmem:[%s1044_s28 + $0x1b8] sm:$0xff] }
  0x23   : > { %252 = vst [vmem:[%s1052_s29 + $0x98] sm:$0xff] %v251_v19  ;;  %254 = vst [vmem:[%s1052_s29 + $0xa0] sm:$0xff] %v253_v20 }
  0x24   : > { %256 = vst [vmem:[%s1052_s29 + $0xa8] sm:$0xff] %v255_v21  ;;  %258 = vst [vmem:[%s1052_s29 + $0xb0] sm:$0xff] %v257_v22 }
  0x25   : > { %260 = vst [vmem:[%s1052_s29 + $0xb8] sm:$0xff] %v259_v23 }
  0x26 PF: > { %p854_p5 = scmp.ge.s32.totalorder %s972_s17, 1  ;;  %p265_p6 = scmp.lt.s32.totalorder %s972_s17, 4 }
  0x28   : > { %p266_p7 = pnand %p854_p5, %p265_p6 }
  0x29   : > { %s272_s30 = sand.u32 (!%p266_p7), 1, %s964_s15   ;;  %s855_s5 = sshll.u32 (!%p266_p7), %s1024_s18, 3 }
  0x2a   : > { %269 = sbr.rel (%p266_p7) target bundleno = 272 (0x110), region = 66  ;;  %p297_p8 = scmp.lt.s32.totalorder (!%p266_p7), %s855_s5, 23 }
  0x2b   : > { %s1100_s6 = smul.u32 (!%p266_p7), 192, %s272_s30  ;;  %s302_s7 = sshrl.u32 (!%p266_p7), %s1024_s18, 2 }
  0x2c   : > { %s303_s8 = sand.u32 (!%p266_p7), 3, %s1024_s18   ;;  %s857_s9 = sshll.u32 (!%p266_p7), %s302_s7, 5 }
  0x2d   : > { %s305_s10 = sadd.s32 (!%p266_p7), %s857_s9, %s303_s8  ;;  %s1308_s0 = sld [smem:[#allocation8_spill]] (!%p266_p7) }
  0x2f   : > { %s1313_s5 = smov (!%p297_p8, %s855_s5), 23 }
  0x30   : > { %s856_s11 = sshll.u32 %s1313_s5, 3 }
  0x31   : > { %s1110_s21 = scalar_lea.vmem %s1304_s4, %s856_s11 }
  0x33   : > { %s306_s14 = scalar_lea.vmem %s1308_s0, %s305_s10  ;;  %s934_s18 = sshll.u32 %s1308_s0, 4  ;;  %s935_s18 = int_to_ptr.vmem [resolvable:$false] %s934_s18 }
  0x34   : > { %s308_s15 = sshll.u32 %s306_s14, 4  ;;  %s936_s26 = scalar_lea.vmem %s935_s18, 512  ;;  %s309_s15 = int_to_ptr.vmem [resolvable:$true] %s308_s15 }
  0x35   : > { %s932_s23 = scalar_lea.vmem %s309_s15, 128  ;;  %p937_p10 = scmp.lt.s32.totalorder %s309_s15, %s935_s18 }
  0x36   : > { %p933_p9 = scmp.ne.s32.totalorder %s309_s15, %s932_s23  ;;  %p938_p11 = scmp.lt.s32.totalorder %s936_s26, %s932_s23 }
  0x38   : > { %p939_p12 = por %p938_p11, %p937_p10 }
  0x3a   : > { %p940_p13 = pnand %p939_p12, %p933_p9 }
  0x3c   : > { %943 = shalt.err (!%p940_p13)  }
  0x3d   : > { %s978_s27 = smov [#allocation2]   ;;  %s979_s28 = smov 64  }
  0x3e   : > { %s980_s29 = smov 16   ;;  %s981_s30 = smov 1  }
  0x3f   : > { %311 = dma.vmem_to_smem %s309_s15, 128, %s978_s27, [#allocation3], %s979_s28, %s980_s29, %s981_s30 }
  0x40   : > { %s1116_s5 = scalar_lea.vmem [#allocation5], %s1100_s6 }
  0x41   : > { %960 = dma.done.wait [#allocation3], 128 }
  0x42   : > { %961 = vsyncadd [#allocation3], 4294967168 }
  0x43   : > { %314 = sfence }
  0x44   : > { %s1118_s7 = smov 0  }
  0x45 LB: >> { %s1124_s8 = sshll.u32 %s976_s7, 4  ;;  %vm326_vm0 = vcmask 57344   ;;  %vm385_vm1 = vcmask 122944   ;;  %s976_s7 = sphi %s1118_s7, %s320_s7  }
  0x46   : >> { %s396_s6 = sadd.s32 10, %s1124_s8  ;;  %s377_s9 = sadd.s32 8, %s1124_s8 }
  0x47   : >> { %s397_s10 = sld [smem:[#allocation2 + %s396_s6]]  ;;  %s405_s11 = sadd.s32 11, %s1124_s8 }
  0x48   : >> { %s378_s12 = sld [smem:[#allocation2 + %s377_s9]]  ;;  %s387_s13 = sadd.s32 9, %s1124_s8 }
  0x49   : >> { %s406_s14 = sld [smem:[#allocation2 + %s405_s11]]  ;;  %s423_s17 = sadd.s32 13, %s1124_s8 }
  0x4a   : >> { %s388_s20 = sld [smem:[#allocation2 + %s387_s13]]  ;;  %s414_s15 = sadd.s32 12, %s1124_s8 }
  0x4b   : >> { %s424_s23 = sld [smem:[#allocation2 + %s423_s17]]  ;;  %s441_s24 = sadd.s32 15, %s1124_s8 }
  0x4c   : >> { %s415_s25 = sld [smem:[#allocation2 + %s414_s15]]  ;;  %s432_s18 = sadd.s32 14, %s1124_s8 }
  0x4d   : >> { %s398_s28 = scalar_lea.vmem %s1303_s3, %s397_s10  ;;  %s1137_s29 = sld [smem:[#allocation2 + %s441_s24]] }
  0x4e   : >> { %v399_v24 = vld [vmem:[%s398_s28] sm:$0x1]  ;;  %s379_s9 = scalar_lea.vmem %s1303_s3, %s378_s12  ;;  %s1142_s11 = sld [smem:[#allocation2 + %s432_s18]] }
  0x4f   : >> { %s982_s13 = smov 8   ;;  %v380_v25 = vld [vmem:[%s379_s9] sm:$0x1]  ;;  %s407_s10 = scalar_lea.vmem %s1303_s3, %s406_s14 }
  0x50   : >> { %401 = vrot.lane.b32.xlu1 %v399_v24, %s982_s13  ;;  %s335_s24 = sadd.s32 2, %s1124_s8  ;;  %382 = vrot.lane.b32.xlu0 %v380_v25, %s982_s13  ;;  %v408_v26 = vld [vmem:[%s407_s10] sm:$0x1]  ;;  %s389_s12 = scalar_lea.vmem %s1303_s3, %s388_s20 }
  0x51   : >> { %s336_s18 = sld [smem:[#allocation2 + %s335_s24]]  ;;  %v390_v27 = vld [vmem:[%s389_s12] sm:$0x1]  ;;  %s425_s6 = scalar_lea.vmem %s1303_s3, %s424_s23 }
  0x52   : >> { %s322_s9 = sld [smem:[#allocation2 + %s1124_s8]]  ;;  %s416_s15 = scalar_lea.vmem %s1303_s3, %s415_s25  ;;  %v426_v28 = vld [vmem:[%s425_s6] sm:$0x1] }
  0x53   : >> { %s342_s0 = sadd.s32 3, %s1124_s8  ;;  %s443_s20 = scalar_lea.vmem %s1303_s3, %s1137_s29  ;;  %v417_v29 = vld [vmem:[%s416_s15] sm:$0x1] }
  0x54   : >> { %410 = vrot.lane.b32.xlu1 %v408_v26, %s982_s13  ;;  %s343_s24 = sld [smem:[#allocation2 + %s342_s0]]  ;;  %392 = vrot.lane.b32.xlu0 %v390_v27, %s982_s13  ;;  %s434_s27 = scalar_lea.vmem %s1303_s3, %s1142_s11  ;;  %v444_v31 = vld [vmem:[%s443_s20] sm:$0x1] }
  0x55   : >> { %s328_s12 = sadd.s32 1, %s1124_s8  ;;  %s356_s28 = sadd.s32 5, %s1124_s8  ;;  %v435_v33 = vld [vmem:[%s434_s27] sm:$0x1] }
  0x56   : >> { %s329_s25 = sld [smem:[#allocation2 + %s328_s12]]  ;;  %s349_s11 = sadd.s32 4, %s1124_s8 }
  0x57   : >> { %s337_s1 = scalar_lea.vmem %s1302_s2, %s336_s18  ;;  %s357_s29 = sld [smem:[#allocation2 + %s356_s28]] }
  0x58   : >> { %428 = vrot.lane.b32.xlu1 %v426_v28, %s982_s13  ;;  %v338_v30 = vld [vmem:[%s337_s1] sm:$0x1]  ;;  %s323_s14 = scalar_lea.vmem %s1302_s2, %s322_s9  ;;  %419 = vrot.lane.b32.xlu0 %v417_v29, %s982_s13  ;;  %s1183_s15 = scalar_lea.vmem [#allocation4], %s976_s7 }
  0x59   : >> { %860 = vst.msk [vmem:[%s1183_s15 + $0x80] sm:$0x1] %vm326_vm0, %v338_v30  ;;  %v324_v32 = vld [vmem:[%s323_s14] sm:$0x1]  ;;  %s350_s18 = sld [smem:[#allocation2 + %s349_s11]]  ;;  %s370_s10 = sadd.s32 7, %s1124_s8 }
  0x5a   : >> { %327 = vst.msk [vmem:[%s1183_s15] sm:$0x1] %vm326_vm0, %v324_v32  ;;  %s344_s23 = scalar_lea.vmem %s1302_s2, %s343_s24  ;;  %s371_s20 = sld [smem:[#allocation2 + %s370_s10]] }
  0x5b   : >> { %v345_v34 = vld [vmem:[%s344_s23] sm:$0x1]  ;;  %s363_s12 = sadd.s32 6, %s1124_s8  ;;  %s320_s7 = sadd.s32 1, %s976_s7  }
  0x5c   : >> { %446 = vrot.lane.b32.xlu1 %v444_v31, %s982_s13  ;;  %861 = vst.msk [vmem:[%s1183_s15 + $0xc0] sm:$0x1] %vm326_vm0, %v345_v34  ;;  %s330_s17 = scalar_lea.vmem %s1302_s2, %s329_s25  ;;  %s364_s27 = sld [smem:[#allocation2 + %s363_s12]]  ;;  %437 = vrot.lane.b32.xlu0 %v435_v33, %s982_s13 }
  0x5d   : >> { %v331_v35 = vld [vmem:[%s330_s17] sm:$0x1]  ;;  %s358_s0 = scalar_lea.vmem %s1302_s2, %s357_s29  ;;  %p317_p0 = scmp.ge.s32.totalorder %s320_s7, 64  }
  0x5e   : >> { %859 = vst.msk [vmem:[%s1183_s15 + $0x40] sm:$0x1] %vm326_vm0, %v331_v35  ;;  %v359_v36 = vld [vmem:[%s358_s0] sm:$0x1]  ;;  %v451_v1 = vld [vmem:[%s1116_s5 + $0x8] sm:$0xff] (%p317_p0)  ;;  %vm732_vm2 = vcmask (%p317_p0), 130048  }
  0x5f   : >> { %863 = vst.msk [vmem:[%s1183_s15 + $0x140] sm:$0x1] %vm326_vm0, %v359_v36  ;;  %s351_s25 = scalar_lea.vmem %s1302_s2, %s350_s18  ;;  %v450_v48 = vld [vmem:[%s1116_s5] sm:$0xff] (%p317_p0)  ;;  %v874_v6 = vld [vmem:[%s1116_s5 + $0x48] sm:$0xff] (%p317_p0)  ;;  %v541_v15 = vsub.f32 (%p317_p0), 1.0, %v451_v1  ;;  %v452_v32 = vld [vmem:[%s1116_s5 + $0x10] sm:$0xff] (%p317_p0) }
  0x60   : >> { %v352_v37 = vld [vmem:[%s351_s25] sm:$0x1]  ;;  %s372_s11 = scalar_lea.vmem %s1302_s2, %s371_s20  ;;  %v540_v54 = vsub.f32 (%p317_p0), 1.0, %v450_v48  ;;  %v1250_v7 = vld [vmem:[%s1116_s5 + $0x88] sm:$0xff] (%p317_p0)  ;;  %v645_v21 = vsub.f32 (%p317_p0), 1.0, %v874_v6 }
  0x61   : >> { %862 = vst.msk [vmem:[%s1183_s15 + $0x100] sm:$0x1] %vm326_vm0, %v352_v37  ;;  %v373_v38 = vld [vmem:[%s372_s11] sm:$0x1]  ;;  %v701_v22 = vsub.f32 (%p317_p0), 1.0, %v1250_v7 }
  0x62   : >> { %865 = vst.msk [vmem:[%s1183_s15 + $0x1c0] sm:$0x1] %vm326_vm0, %v373_v38  ;;  %s365_s9 = scalar_lea.vmem %s1302_s2, %s364_s27  ;;  %v873_v49 = vld [vmem:[%s1116_s5 + $0x40] sm:$0xff] (%p317_p0) }
  0x63   : >> { %v366_v39 = vld [vmem:[%s365_s9] sm:$0x1]  ;;  %v644_v58 = vsub.f32 (%p317_p0), 1.0, %v873_v49 }
  0x64   : >> { %864 = vst.msk [vmem:[%s1183_s15 + $0x180] sm:$0x1] %vm326_vm0, %v366_v39  ;;  %v1245_v50 = vld [vmem:[%s1116_s5 + $0x80] sm:$0xff] (%p317_p0) }
  0x65   : > { %v700_v11 = vsub.f32 (%p317_p0), 1.0, %v1245_v50 }
  0xc2   : >> { %v402_v40 = vpop.permute.xlu1 %401  ;;  %v383_v41 = vpop.permute.xlu0 %382 }
  0xc3   : >> { %867 = vst.msk [vmem:[%s1183_s15 + $0x80] sm:$0x1] %vm385_vm1, %v402_v40  ;;  %386 = vst.msk [vmem:[%s1183_s15] sm:$0x1] %vm385_vm1, %v383_v41 }
  0xc6   : >> { %v411_v42 = vpop.permute.xlu1 %410  ;;  %v393_v43 = vpop.permute.xlu0 %392 }
  0xc7   : >> { %868 = vst.msk [vmem:[%s1183_s15 + $0xc0] sm:$0x1] %vm385_vm1, %v411_v42  ;;  %866 = vst.msk [vmem:[%s1183_s15 + $0x40] sm:$0x1] %vm385_vm1, %v393_v43 }
  0xca   : >> { %v429_v44 = vpop.permute.xlu1 %428  ;;  %v420_v45 = vpop.permute.xlu0 %419 }
  0xcb   : >> { %870 = vst.msk [vmem:[%s1183_s15 + $0x140] sm:$0x1] %vm385_vm1, %v429_v44  ;;  %869 = vst.msk [vmem:[%s1183_s15 + $0x100] sm:$0x1] %vm385_vm1, %v420_v45  ;;  %319 = sbr.rel (!%p317_p0) target bundleno = 69 (0x45), region = 139 }
  0xce   : >> { %v447_v46 = vpop.permute.xlu1 %446  ;;  %v438_v47 = vpop.permute.xlu0 %437 }
  0xcf   : >> { %872 = vst.msk [vmem:[%s1183_s15 + $0x1c0] sm:$0x1] %vm385_vm1, %v447_v46  ;;  %871 = vst.msk [vmem:[%s1183_s15 + $0x180] sm:$0x1] %vm385_vm1, %v438_v47 }
  0xd6   : > { %v476_v51 = vld [vmem:[#allocation4] sm:$0xff]  ;;  %v477_v8 = vld [vmem:[#allocation4 + $0x8] sm:$0xff]  ;;  %v510_v37 = vld [vmem:[#allocation4 + $0x110] sm:$0xff] }
  0xd7   : > { %v484_v52 = vld [vmem:[#allocation4 + $0x40] sm:$0xff]  ;;  %v548_v61 = vmul.f32 %v540_v54, %v476_v51  ;;  %v485_v12 = vld [vmem:[#allocation4 + $0x48] sm:$0xff]  ;;  %v549_v26 = vmul.f32 %v541_v15, %v477_v8  ;;  %v478_v42 = vld [vmem:[#allocation4 + $0x10] sm:$0xff]  ;;  %v558_v51 = vmul.f32 %v510_v37, %v452_v32 }
  0xd8   : > { %v492_v53 = vld [vmem:[#allocation4 + $0x80] sm:$0xff]  ;;  %v572_v63 = vmul.f32 %v540_v54, %v484_v52  ;;  %v493_v13 = vld [vmem:[#allocation4 + $0x88] sm:$0xff]  ;;  %v573_v30 = vmul.f32 %v541_v15, %v485_v12  ;;  %v486_v43 = vld [vmem:[#allocation4 + $0x50] sm:$0xff] }
  0xd9   : > { %v500_v55 = vld [vmem:[#allocation4 + $0xc0] sm:$0xff]  ;;  %v596_v2 = vmul.f32 %v540_v54, %v492_v53  ;;  %v501_v14 = vld [vmem:[#allocation4 + $0xc8] sm:$0xff]  ;;  %v597_v34 = vmul.f32 %v541_v15, %v493_v13  ;;  %v518_v44 = vld [vmem:[#allocation4 + $0x150] sm:$0xff] }
  0xda   : > { %v508_v56 = vld [vmem:[#allocation4 + $0x100] sm:$0xff]  ;;  %v620_v4 = vmul.f32 %v540_v54, %v500_v55  ;;  %v509_v18 = vld [vmem:[#allocation4 + $0x108] sm:$0xff]  ;;  %v621_v36 = vmul.f32 %v541_v15, %v501_v14  ;;  %v494_v47 = vld [vmem:[#allocation4 + $0x90] sm:$0xff] }
  0xdb   : > { %v516_v57 = vld [vmem:[#allocation4 + $0x140] sm:$0xff]  ;;  %v556_v62 = vmul.f32 %v508_v56, %v450_v48  ;;  %v517_v19 = vld [vmem:[#allocation4 + $0x148] sm:$0xff]  ;;  %v557_v27 = vmul.f32 %v509_v18, %v451_v1  ;;  %v502_v56 = vld [vmem:[#allocation4 + $0xd0] sm:$0xff] }
  0xdc   : > { %v524_v59 = vld [vmem:[#allocation4 + $0x180] sm:$0xff]  ;;  %v580_v0 = vmul.f32 %v516_v57, %v450_v48  ;;  %v525_v20 = vld [vmem:[#allocation4 + $0x188] sm:$0xff]  ;;  %v581_v31 = vmul.f32 %v517_v19, %v451_v1  ;;  %v479_v15 = vld [vmem:[#allocation4 + $0x18] sm:$0xff] }
  0xdd   : > { %v532_v60 = vld [vmem:[#allocation4 + $0x1c0] sm:$0xff]  ;;  %v604_v3 = vmul.f32 %v524_v59, %v450_v48  ;;  %v564_v9 = vadd.f32 %v556_v62, %v548_v61  ;;  %v533_v25 = vld [vmem:[#allocation4 + $0x1c8] sm:$0xff]  ;;  %v565_v33 = vadd.f32 %v557_v27, %v549_v26  ;;  %v605_v35 = vmul.f32 %v525_v20, %v451_v1  ;;  %v534_v59 = vld [vmem:[#allocation4 + $0x1d0] sm:$0xff] }
  0xde   : > { %v628_v5 = vmul.f32 %v532_v60, %v450_v48  ;;  %v588_v10 = vadd.f32 %v580_v0, %v572_v63  ;;  %v589_v40 = vadd.f32 %v581_v31, %v573_v30  ;;  %v629_v41 = vmul.f32 %v533_v25, %v451_v1  ;;  %v526_v48 = vld [vmem:[#allocation4 + $0x190] sm:$0xff]  ;;  %v495_v19 = vld [vmem:[#allocation4 + $0x98] sm:$0xff] }
  0xdf   : > { %v612_v16 = vadd.f32 %v604_v3, %v596_v2  ;;  %v652_v23 = vmul.f32 %v644_v58, %v564_v9  ;;  %v613_v45 = vadd.f32 %v605_v35, %v597_v34  ;;  %v653_v46 = vmul.f32 %v645_v21, %v565_v33  ;;  %v883_v1 = vld [vmem:[%s1116_s5 + $0x90] sm:$0xff]  ;;  %v503_v27 = vld [vmem:[#allocation4 + $0xd8] sm:$0xff] }
  0xe0   : > { %v636_v17 = vadd.f32 %v628_v5, %v620_v4  ;;  %v676_v24 = vmul.f32 %v644_v58, %v588_v10  ;;  %v637_v54 = vadd.f32 %v629_v41, %v621_v36  ;;  %v677_v55 = vmul.f32 %v645_v21, %v589_v40  ;;  %v875_v58 = vld [vmem:[%s1116_s5 + $0x50] sm:$0xff]  ;;  %v453_v4 = vld [vmem:[%s1116_s5 + $0x18] sm:$0xff] }
  0xe1   : > { %v660_v28 = vmul.f32 %v873_v49, %v612_v16  ;;  %v661_v57 = vmul.f32 %v874_v6, %v613_v45  ;;  %v582_v62 = vmul.f32 %v518_v44, %v452_v32  ;;  %v606_v3 = vmul.f32 %v526_v48, %v452_v32  ;;  %v511_v5 = vld [vmem:[#allocation4 + $0x118] sm:$0xff]  ;;  %v480_v48 = vld [vmem:[#allocation4 + $0x20] sm:$0xff] }
  0xe2   : > { %v684_v29 = vmul.f32 %v873_v49, %v636_v17  ;;  %v542_v49 = vsub.f32 1.0, %v452_v32  ;;  %v685_v0 = vmul.f32 %v874_v6, %v637_v54  ;;  %v630_v13 = vmul.f32 %v534_v59, %v452_v32  ;;  %v487_v16 = vld [vmem:[#allocation4 + $0x58] sm:$0xff]  ;;  %v496_v54 = vld [vmem:[#allocation4 + $0xa0] sm:$0xff] }
  0xe3   : > { %v668_v38 = vadd.f32 %v660_v28, %v652_v23  ;;  %v669_v8 = vadd.f32 %v661_v57, %v653_v46  ;;  %v646_v14 = vsub.f32 1.0, %v875_v58  ;;  %v519_v17 = vld [vmem:[#allocation4 + $0x158] sm:$0xff]  ;;  %v702_v18 = vsub.f32 1.0, %v883_v1 }
  0xe4   : > { %v692_v39 = vadd.f32 %v684_v29, %v676_v24  ;;  %v550_v60 = vmul.f32 %v542_v49, %v478_v42  ;;  %v574_v61 = vmul.f32 %v542_v49, %v486_v43  ;;  %v598_v2 = vmul.f32 %v542_v49, %v494_v47  ;;  %v527_v28 = vld [vmem:[#allocation4 + $0x198] sm:$0xff] }
  0xe5   : > { %v708_v52 = vmul.f32 %v700_v11, %v668_v38  ;;  %v622_v10 = vmul.f32 %v542_v49, %v502_v56  ;;  %v693_v11 = vadd.f32 %v685_v0, %v677_v55  ;;  %v709_v6 = vmul.f32 %v701_v22, %v669_v8  ;;  %v876_v30 = vld [vmem:[%s1116_s5 + $0x58] sm:$0xff]  ;;  %v488_v49 = vld [vmem:[#allocation4 + $0x60] sm:$0xff] }
  0xe6   : > { %v716_v53 = vmul.f32 %v1245_v50, %v692_v39  ;;  %v566_v9 = vadd.f32 %v558_v51, %v550_v60  ;;  %v590_v50 = vadd.f32 %v582_v62, %v574_v61  ;;  %v614_v12 = vadd.f32 %v606_v3, %v598_v2  ;;  %v535_v31 = vld [vmem:[#allocation4 + $0x1d8] sm:$0xff]  ;;  %v454_v39 = vld [vmem:[%s1116_s5 + $0x20] sm:$0xff] }
  0xe7   : > { %v543_v20 = vsub.f32 1.0, %v453_v4  ;;  %v559_v21 = vmul.f32 %v511_v5, %v453_v4  ;;  %v717_v23 = vmul.f32 %v1250_v7, %v693_v11  ;;  %v638_v24 = vadd.f32 %v630_v13, %v622_v10  ;;  %v884_v37 = vld [vmem:[%s1116_s5 + $0x98] sm:$0xff]  ;;  %v512_v7 = vld [vmem:[#allocation4 + $0x120] sm:$0xff]  ;;  %v513_v13 = vld [vmem:[#allocation4 + $0x128] sm:$0xff] }
  0xe8   : > { %v724_v63 = vadd.f32 %v716_v53, %v708_v52  ;;  %v654_v25 = vmul.f32 %v646_v14, %v566_v9  ;;  %v662_v26 = vmul.f32 %v875_v58, %v614_v12  ;;  %v678_v29 = vmul.f32 %v646_v14, %v590_v50  ;;  %v520_v51 = vld [vmem:[#allocation4 + $0x160] sm:$0xff]  ;;  %v455_v12 = vld [vmem:[%s1116_s5 + $0x28] sm:$0xff] }
  0xe9   : > { %v551_v32 = vmul.f32 %v543_v20, %v479_v15  ;;  %v575_v33 = vmul.f32 %v543_v20, %v487_v16  ;;  %v583_v22 = vmul.f32 %v519_v17, %v453_v4  ;;  %v725_v34 = vadd.f32 %v717_v23, %v709_v6  ;;  %v528_v55 = vld [vmem:[#allocation4 + $0x1a0] sm:$0xff]  ;;  %v521_v23 = vld [vmem:[#allocation4 + $0x168] sm:$0xff] }
  0xea   : > { %733 = vst.msk [vmem:[%s1110_s21] sm:$0xff] %vm732_vm2, %v724_v63  ;;  %v670_v35 = vadd.f32 %v662_v26, %v654_v25  ;;  %v686_v36 = vmul.f32 %v875_v58, %v638_v24  ;;  %v599_v38 = vmul.f32 %v543_v20, %v495_v19  ;;  %v607_v42 = vmul.f32 %v527_v28, %v453_v4  ;;  %v504_v62 = vld [vmem:[#allocation4 + $0xe0] sm:$0xff]  ;;  %v497_v26 = vld [vmem:[#allocation4 + $0xa8] sm:$0xff] }
  0xeb   : > { %v567_v40 = vadd.f32 %v559_v21, %v551_v32  ;;  %v591_v41 = vadd.f32 %v583_v22, %v575_v33  ;;  %v623_v43 = vmul.f32 %v543_v20, %v503_v27  ;;  %734 = vst.msk [vmem:[%s1110_s21 + $0x8] sm:$0xff] %vm732_vm2, %v725_v34  ;;  %v631_v46 = vmul.f32 %v535_v31, %v453_v4  ;;  %v877_v0 = vld [vmem:[%s1116_s5 + $0x60] sm:$0xff]  ;;  %v481_v20 = vld [vmem:[#allocation4 + $0x28] sm:$0xff] }
  0xec   : > { %v694_v44 = vadd.f32 %v686_v36, %v678_v29  ;;  %v710_v45 = vmul.f32 %v702_v18, %v670_v35  ;;  %v647_v47 = vsub.f32 1.0, %v876_v30  ;;  %v615_v52 = vadd.f32 %v607_v42, %v599_v38  ;;  %v536_v2 = vld [vmem:[#allocation4 + $0x1e0] sm:$0xff]  ;;  %v489_v21 = vld [vmem:[#allocation4 + $0x68] sm:$0xff] }
  0xed   : > { %v703_v53 = vsub.f32 1.0, %v884_v37  ;;  %v544_v56 = vsub.f32 1.0, %v454_v39  ;;  %v560_v57 = vmul.f32 %v512_v7, %v454_v39  ;;  %v639_v59 = vadd.f32 %v631_v46, %v623_v43  ;;  %v885_v50 = vld [vmem:[%s1116_s5 + $0xa0] sm:$0xff]  ;;  %v505_v33 = vld [vmem:[#allocation4 + $0xe8] sm:$0xff] }
  0xee   : > { %v718_v58 = vmul.f32 %v883_v1, %v694_v44  ;;  %v655_v60 = vmul.f32 %v647_v47, %v567_v40  ;;  %v679_v61 = vmul.f32 %v647_v47, %v591_v41  ;;  %v663_v63 = vmul.f32 %v876_v30, %v615_v52  ;;  %v529_v22 = vld [vmem:[#allocation4 + $0x1a8] sm:$0xff] }
  0xef   : > { %v552_v3 = vmul.f32 %v544_v56, %v480_v48  ;;  %v576_v4 = vmul.f32 %v544_v56, %v488_v49  ;;  %v584_v5 = vmul.f32 %v520_v51, %v454_v39  ;;  %v687_v9 = vmul.f32 %v876_v30, %v639_v59  ;;  %v878_v35 = vld [vmem:[%s1116_s5 + $0x68] sm:$0xff] }
  0xf0   : > { %v726_v8 = vadd.f32 %v718_v58, %v710_v45  ;;  %v600_v10 = vmul.f32 %v544_v56, %v496_v54  ;;  %v608_v11 = vmul.f32 %v528_v55, %v454_v39  ;;  %v671_v1 = vadd.f32 %v663_v63, %v655_v60  ;;  %v537_v36 = vld [vmem:[#allocation4 + $0x1e8] sm:$0xff]  ;;  %v456_v45 = vld [vmem:[%s1116_s5 + $0x30] sm:$0xff] }
  0xf1   : > { %v568_v14 = vadd.f32 %v560_v57, %v552_v3  ;;  %v592_v15 = vadd.f32 %v584_v5, %v576_v4  ;;  %v624_v16 = vmul.f32 %v544_v56, %v504_v62  ;;  %v695_v17 = vadd.f32 %v687_v9, %v679_v61  ;;  %v886_v43 = vld [vmem:[%s1116_s5 + $0xa8] sm:$0xff]  ;;  %v482_v55 = vld [vmem:[#allocation4 + $0x30] sm:$0xff] }
  0xf2   : > { %735 = vst.msk [vmem:[%s1110_s21 + $0x10] sm:$0xff] %vm732_vm2, %v726_v8  ;;  %v616_v6 = vadd.f32 %v608_v11, %v600_v10  ;;  %v632_v18 = vmul.f32 %v536_v2, %v454_v39  ;;  %v648_v19 = vsub.f32 1.0, %v877_v0  ;;  %v711_v24 = vmul.f32 %v703_v53, %v671_v1  ;;  %v490_v56 = vld [vmem:[#allocation4 + $0x70] sm:$0xff] }
  0xf3   : > { %v704_v25 = vsub.f32 1.0, %v885_v50  ;;  %v545_v27 = vsub.f32 1.0, %v455_v12  ;;  %v561_v28 = vmul.f32 %v513_v13, %v455_v12  ;;  %v719_v29 = vmul.f32 %v884_v37, %v695_v17  ;;  %v514_v37 = vld [vmem:[#allocation4 + $0x130] sm:$0xff] }
  0xf4   : > { %v640_v30 = vadd.f32 %v632_v18, %v624_v16  ;;  %v656_v31 = vmul.f32 %v648_v19, %v568_v14  ;;  %v664_v32 = vmul.f32 %v877_v0, %v616_v6  ;;  %v680_v34 = vmul.f32 %v648_v19, %v592_v15  ;;  %v522_v57 = vld [vmem:[#allocation4 + $0x170] sm:$0xff]  ;;  %v457_v6 = vld [vmem:[%s1116_s5 + $0x38] sm:$0xff] }
  0xf5   : > { %v553_v38 = vmul.f32 %v545_v27, %v481_v20  ;;  %v577_v39 = vmul.f32 %v545_v27, %v489_v21  ;;  %v585_v7 = vmul.f32 %v521_v23, %v455_v12  ;;  %v727_v40 = vadd.f32 %v719_v29, %v711_v24  ;;  %v498_v60 = vld [vmem:[#allocation4 + $0xb0] sm:$0xff]  ;;  %v515_v18 = vld [vmem:[#allocation4 + $0x138] sm:$0xff] }
  0xf6   : > { %v672_v41 = vadd.f32 %v664_v32, %v656_v31  ;;  %v688_v42 = vmul.f32 %v877_v0, %v640_v30  ;;  %v601_v44 = vmul.f32 %v545_v27, %v497_v26  ;;  %v609_v48 = vmul.f32 %v529_v22, %v455_v12  ;;  %v530_v61 = vld [vmem:[#allocation4 + $0x1b0] sm:$0xff]  ;;  %v523_v29 = vld [vmem:[#allocation4 + $0x178] sm:$0xff] }
  0xf7   : > { %v569_v46 = vadd.f32 %v561_v28, %v553_v38  ;;  %v593_v47 = vadd.f32 %v585_v7, %v577_v39  ;;  %v625_v49 = vmul.f32 %v545_v27, %v505_v33  ;;  %736 = vst.msk [vmem:[%s1110_s21 + $0x18] sm:$0xff] %vm732_vm2, %v727_v40  ;;  %v633_v53 = vmul.f32 %v537_v36, %v455_v12  ;;  %v506_v5 = vld [vmem:[#allocation4 + $0xf0] sm:$0xff]  ;;  %v483_v27 = vld [vmem:[#allocation4 + $0x38] sm:$0xff] }
  0xf8   : > { %v696_v51 = vadd.f32 %v688_v42, %v680_v34  ;;  %v712_v52 = vmul.f32 %v704_v25, %v672_v41  ;;  %v649_v54 = vsub.f32 1.0, %v878_v35  ;;  %v617_v58 = vadd.f32 %v609_v48, %v601_v44  ;;  %v879_v9 = vld [vmem:[%s1116_s5 + $0x70] sm:$0xff]  ;;  %v491_v28 = vld [vmem:[#allocation4 + $0x78] sm:$0xff] }
  0xf9   : > { %v705_v59 = vsub.f32 1.0, %v886_v43  ;;  %v546_v62 = vsub.f32 1.0, %v456_v45  ;;  %v562_v63 = vmul.f32 %v514_v37, %v456_v45  ;;  %v641_v2 = vadd.f32 %v633_v53, %v625_v49  ;;  %v538_v10 = vld [vmem:[#allocation4 + $0x1f0] sm:$0xff]  ;;  %v499_v32 = vld [vmem:[#allocation4 + $0xb8] sm:$0xff] }
  0xfa   : > { %v720_v0 = vmul.f32 %v885_v50, %v696_v51  ;;  %v657_v3 = vmul.f32 %v649_v54, %v569_v46  ;;  %v681_v4 = vmul.f32 %v649_v54, %v593_v47  ;;  %v665_v8 = vmul.f32 %v878_v35, %v617_v58  ;;  %v887_v15 = vld [vmem:[%s1116_s5 + $0xb0] sm:$0xff]  ;;  %v507_v39 = vld [vmem:[#allocation4 + $0xf8] sm:$0xff] }
  0xfb   : > { %v554_v11 = vmul.f32 %v546_v62, %v482_v55  ;;  %v578_v12 = vmul.f32 %v546_v62, %v490_v56  ;;  %v586_v13 = vmul.f32 %v522_v57, %v456_v45  ;;  %v689_v14 = vmul.f32 %v878_v35, %v641_v2  ;;  %v531_v7 = vld [vmem:[#allocation4 + $0x1b8] sm:$0xff] }
  0xfc   : > { %v728_v1 = vadd.f32 %v720_v0, %v712_v52  ;;  %v602_v16 = vmul.f32 %v546_v62, %v498_v60  ;;  %v610_v17 = vmul.f32 %v530_v61, %v456_v45  ;;  %v673_v50 = vadd.f32 %v665_v8, %v657_v3  ;;  %v880_v41 = vld [vmem:[%s1116_s5 + $0x78] sm:$0xff] }
  0xfd   : > { %v570_v19 = vadd.f32 %v562_v63, %v554_v11  ;;  %v594_v20 = vadd.f32 %v586_v13, %v578_v12  ;;  %v626_v21 = vmul.f32 %v546_v62, %v506_v5  ;;  %v697_v23 = vadd.f32 %v689_v14, %v681_v4  ;;  %v539_v42 = vld [vmem:[#allocation4 + $0x1f8] sm:$0xff] }
  0xfe   : > { %737 = vst.msk [vmem:[%s1110_s21 + $0x20] sm:$0xff] %vm732_vm2, %v728_v1  ;;  %v618_v24 = vadd.f32 %v610_v17, %v602_v16  ;;  %v634_v25 = vmul.f32 %v538_v10, %v456_v45  ;;  %v650_v26 = vsub.f32 1.0, %v879_v9  ;;  %v713_v30 = vmul.f32 %v705_v59, %v673_v50  ;;  %v888_v56 = vld [vmem:[%s1116_s5 + $0xb8] sm:$0xff] }
  0xff   : > { %v706_v31 = vsub.f32 1.0, %v887_v15  ;;  %v547_v33 = vsub.f32 1.0, %v457_v6  ;;  %v563_v22 = vmul.f32 %v515_v18, %v457_v6  ;;  %v721_v34 = vmul.f32 %v886_v43, %v697_v23 }
 0x100   : > { %v642_v35 = vadd.f32 %v634_v25, %v626_v21  ;;  %v658_v36 = vmul.f32 %v650_v26, %v570_v19  ;;  %v666_v38 = vmul.f32 %v879_v9, %v618_v24  ;;  %v682_v40 = vmul.f32 %v650_v26, %v594_v20 }
 0x101   : > { %v555_v44 = vmul.f32 %v547_v33, %v483_v27  ;;  %v579_v45 = vmul.f32 %v547_v33, %v491_v28  ;;  %v587_v37 = vmul.f32 %v523_v29, %v457_v6  ;;  %v729_v46 = vadd.f32 %v721_v34, %v713_v30 }
 0x102   : > { %v674_v47 = vadd.f32 %v666_v38, %v658_v36  ;;  %v690_v48 = vmul.f32 %v879_v9, %v642_v35  ;;  %v603_v49 = vmul.f32 %v547_v33, %v499_v32  ;;  %v611_v43 = vmul.f32 %v531_v7, %v457_v6 }
 0x103   : > { %v571_v51 = vadd.f32 %v563_v22, %v555_v44  ;;  %v595_v52 = vadd.f32 %v587_v37, %v579_v45  ;;  %v627_v53 = vmul.f32 %v547_v33, %v507_v39  ;;  %738 = vst.msk [vmem:[%s1110_s21 + $0x28] sm:$0xff] %vm732_vm2, %v729_v46  ;;  %v635_v57 = vmul.f32 %v539_v42, %v457_v6 }
 0x104   : > { %v698_v54 = vadd.f32 %v690_v48, %v682_v40  ;;  %v714_v55 = vmul.f32 %v706_v31, %v674_v47  ;;  %v651_v58 = vsub.f32 1.0, %v880_v41  ;;  %v619_v59 = vadd.f32 %v611_v43, %v603_v49 }
 0x105   : > { %v643_v61 = vadd.f32 %v635_v57, %v627_v53  ;;  %v707_v2 = vsub.f32 1.0, %v888_v56 }
 0x106   : > { %v722_v60 = vmul.f32 %v887_v15, %v698_v54  ;;  %v659_v62 = vmul.f32 %v651_v58, %v571_v51  ;;  %v683_v63 = vmul.f32 %v651_v58, %v595_v52  ;;  %v667_v0 = vmul.f32 %v880_v41, %v619_v59 }
 0x107   : > { %v691_v4 = vmul.f32 %v880_v41, %v643_v61 }
 0x108   : > { %v730_v3 = vadd.f32 %v722_v60, %v714_v55  ;;  %v675_v5 = vadd.f32 %v667_v0, %v659_v62 }
 0x109   : > { %v699_v8 = vadd.f32 %v691_v4, %v683_v63 }
 0x10a   : > { %739 = vst.msk [vmem:[%s1110_s21 + $0x30] sm:$0xff] %vm732_vm2, %v730_v3  ;;  %v715_v9 = vmul.f32 %v707_v2, %v675_v5 }
 0x10b   : > { %v723_v10 = vmul.f32 %v888_v56, %v699_v8 }
 0x10d   : > { %v731_v11 = vadd.f32 %v723_v10, %v715_v9 }
 0x10f   : > { %740 = vst.msk [vmem:[%s1110_s21 + $0x38] sm:$0xff] %vm732_vm2, %v731_v11 }
 0x110 PF: > { %p11_p1 = scmp.ge.s32.totalorder %s1027_s19, 5   ;;  %s1309_s15 = smov %s968_s16 }
 0x111   : > { %s1310_s16 = smov %s1036_s22  ;;  %s1311_s17 = smov %s1027_s19 }
 0x112   :  { %13 = sbr.rel (!%p11_p1) target bundleno = 5 (0x5), region = 150 }
 0x117   :  { %763 = vsyncmov [#allocation3] }
 0x11a   :  { %s764_s5 = vpop.sfrf %763 }
 0x11b   :  { %p891_p2 = scmp.ne.s32.totalorder %s764_s5, 0 }
 0x11d   :  { %768 = shalt.err (%p891_p2)  }

</bundles_post_ra>
